<compile_context>
chip_gen: v6e
topology: v6e:2x2x1
jax: 0.10.0
libtpu: 0.0.40
codegen_flags: <defaults>
</compile_context>

<pallas_src>
import functools
import math

import jax
import jax.numpy as jnp
from jax.experimental import pallas as pl
from jax.experimental.pallas import tpu as pltpu


def _make_pe(d_model: int, max_len: int, dtype=jnp.float32) -> jnp.ndarray:
    """Sinusoidal positional-encoding buffer, same values as the PyTorch __init__.

    Stored as [max_len, d_model] (the module's size-1 batch dim is squeezed)."""
    position = jnp.arange(max_len, dtype=jnp.float32)[:, None]                # [L, 1]
    div_term = jnp.exp(
        jnp.arange(0, d_model, 2, dtype=jnp.float32)
        * (-math.log(10000.0) / d_model)
    )                                                                          # [D/2]
    pe = jnp.zeros((max_len, d_model), dtype=jnp.float32)
    pe = pe.at[:, 0::2].set(jnp.sin(position * div_term))
    pe = pe.at[:, 1::2].set(jnp.cos(position * div_term))
    return pe.astype(dtype)


def _pos_enc_kernel(x_ref, pe_ref, o_ref, *, batch: int, d_model: int):
    # x_ref / o_ref: (ts, B*D) lane-dense tiles; pe_ref: (ts, D).
    pe = pe_ref[...]                       # loaded once, reused for every replica
    if batch == 1:
        o_ref[...] = x_ref[...] + pe
    else:
        # Per-replica static lane slices: no (ts, B*D) pe temp is materialized
        # in VMEM (the old concat doubled store-slot traffic and VMEM scratch).
        # Slices start at b*D lanes, so for D % 128 == 0 every load/store is an
        # unmasked, lane-dense vector op streaming straight HBM<->vreg.
        for b in range(batch):
            sl = slice(b * d_model, (b + 1) * d_model)
            o_ref[:, sl] = x_ref[:, sl] + pe


def _round_up(n: int, m: int) -> int:
    return -(-n // m) * m


def _vmem_limit_bytes(default: int = 48 * 1024 * 1024) -> int:
    """Scoped-VMEM limit: ~3/4 of physical, capped at 64 MiB.

    -> ~48 MiB on v7x (64 MiB/TC), 64 MiB on v5e/v6e (128 MiB physical)."""
    try:
        cap = int(pltpu.get_tpu_info().vmem_capacity_bytes)
        return max(default, min(cap * 3 // 4, 64 * 1024 * 1024))
    except Exception:
        return default


def _pick_seq_tile(seq_len: int, row_bytes: int, *,
                   target_tile_bytes: int = 4 << 20,
                   min_grid_steps: int = 4) -> int:
    """Rows per sequence tile: multiple of 8, <= ~4 MiB of x per tile, and at
    least `min_grid_steps` grid steps when the sequence allows (so v7x's two
    TensorCores each get >= 2 pipelined steps on the "parallel" axis)."""
    ts = max(8, (target_tile_bytes // max(row_bytes, 1)) // 8 * 8)
    if seq_len >= min_grid_steps * 8:
        per_step = _round_up(pl.cdiv(seq_len, min_grid_steps), 8)
        ts = min(ts, per_step)
    return min(ts, _round_up(seq_len, 8))   # never bigger than one padded pass


def _positional_encoding_pallas(x: jnp.ndarray, pe: jnp.ndarray,
                                *, donate_x: bool = False) -> jnp.ndarray:
    """x: [S, B, D], pe: [max_len, D] -> [S, B, D] via the Pallas kernel."""
    S, B, D = x.shape
    assert pe.shape[0] >= S, "pe buffer (max_len) shorter than sequence length"
    pe = pe.astype(x.dtype)                                # single cast point

    x2 = x.reshape(S, B * D)                               # free view: contiguous collapse
    row_bytes = B * D * x.dtype.itemsize
    ts = _pick_seq_tile(S, row_bytes)
    grid = (pl.cdiv(S, ts),)

    out2 = pl.pallas_call(
        functools.partial(_pos_enc_kernel, batch=B, d_model=D),
        out_shape=jax.ShapeDtypeStruct((S, B * D), x.dtype),
        grid_spec=pltpu.PrefetchScalarGridSpec(
            num_scalar_prefetch=0,
            grid=grid,
            in_specs=[
                # x slab: last dim is the full extent -> always (8,128)-legal & lane-dense.
                pl.BlockSpec((ts, B * D), lambda i: (i, 0)),
                # full pe buffer (no wrapper slice); index_map picks the seq rows,
                # so pe HBM traffic is S*D, not S*B*D.
                pl.BlockSpec((ts, D), lambda i: (i, 0)),
            ],
            out_specs=pl.BlockSpec((ts, B * D), lambda i: (i, 0)),
        ),
        compiler_params=pltpu.CompilerParams(
            dimension_semantics=("parallel",),
            vmem_limit_bytes=_vmem_limit_bytes(),
        ),
        input_output_aliases=({0: 0} if donate_x else {}),
    )(x2, pe)
    return out2.reshape(S, B, D)


def positional_encoding(x: jnp.ndarray, pe: jnp.ndarray,
                        *, min_kernel_bytes: int = 256 * 1024,
                        donate_x: bool = False) -> jnp.ndarray:
    """Forward pass of the module (dropout p=0.0 is the identity).

    x: [S, B, D]; pe: [max_len, D] from _make_pe."""
    S, B, D = x.shape
    assert pe.shape[0] >= S, "pe buffer (max_len) shorter than sequence length"
    x_bytes = x.size * x.dtype.itemsize
    if x_bytes < min_kernel_bytes or D % 128 != 0:
        # Tiny input (pallas_call fixed cost dominates) or lane-sparse d_model
        # (sub-128-wide slices -> masked vst.msk stores, measured ~4.5x slower):
        # XLA's fused broadcast-add is already ~roofline for this op.
        return x + pe[:S].astype(x.dtype)[:, None, :]
    return _positional_encoding_pallas(x, pe, donate_x=donate_x)


if __name__ == "__main__":
    max_len = 1024
    key = jax.random.PRNGKey(0)

    # 1) Small shape implied by the module's forward: [seq_len, batch, d_model].
    #    d_model=128 keeps the per-replica slices lane-dense; call the Pallas
    #    path directly so the kernel itself is exercised at small size.
    seq_len, batch, d_model = 8, 2, 128
    x_small = jax.random.normal(key, (seq_len, batch, d_model), dtype=jnp.float32)
    pe_small = _make_pe(d_model, max_len)
    out_small = jax.block_until_ready(_positional_encoding_pallas(x_small, pe_small))
    ref_small = x_small + pe_small[:seq_len][:, None, :]
    assert out_small.shape == (seq_len, batch, d_model)
    assert jnp.allclose(out_small, ref_small, atol=1e-6), "small-shape mismatch vs reference"

    # 2) Larger shape exercising real sequence tiling (>= 4 grid steps,
    #    double-buffering, per-replica slice adds) through the public wrapper.
    S2, B2, D2 = 512, 4, 256
    k1, _ = jax.random.split(key)
    x_big = jax.random.normal(k1, (S2, B2, D2), dtype=jnp.float32)
    pe_big = _make_pe(D2, max_len)
    out_big = jax.block_until_ready(positional_encoding(x_big, pe_big))
    ref_big = x_big + pe_big[:S2][:, None, :]
    assert jnp.allclose(out_big, ref_big, atol=1e-6), "tiled-shape mismatch vs reference"

    print("KERNEL_OK")
</pallas_src>

<mosaic_0001>
module attributes {stable_mosaic.version = 11 : i64} {
  func.func @_pos_enc_kernel(%arg0: i32, %arg1: memref<8x256xf32, #tpu.memory_space<vmem>>, %arg2: memref<8x128xf32, #tpu.memory_space<vmem>>, %arg3: memref<8x256xf32, #tpu.memory_space<vmem>>) attributes {dimension_semantics = [#tpu.dimension_semantics<parallel>], iteration_bounds = array<i64: 1>, scalar_prefetch = 0 : i64, scratch_operands = 0 : i64, tpu.core_type = #tpu.core_type<tc>, window_params = [{transform_indices = @transform_0, window_bounds = array<i64: 8, 256>}, {transform_indices = @transform_1, window_bounds = array<i64: 8, 128>}, {transform_indices = @transform_2, window_bounds = array<i64: 8, 256>}]} {
    %c0 = arith.constant 0 : index
    %c0_0 = arith.constant 0 : index
    %0 = vector.load %arg2[%c0, %c0_0] : memref<8x128xf32, #tpu.memory_space<vmem>>, vector<8x128xf32>
    %c0_1 = arith.constant 0 : index
    %c0_2 = arith.constant 0 : index
    %1 = vector.load %arg1[%c0_1, %c0_2] : memref<8x256xf32, #tpu.memory_space<vmem>>, vector<8x128xf32>
    %2 = arith.addf %1, %0 : vector<8x128xf32>
    %c0_3 = arith.constant 0 : index
    %c0_4 = arith.constant 0 : index
    %3 = vector.load %arg3[%c0_3, %c0_4] : memref<8x256xf32, #tpu.memory_space<vmem>>, vector<8x128xf32>
    tpu.vector_store %arg3[%c0_3, %c0_4], %2 {strides = array<i32>} : memref<8x256xf32, #tpu.memory_space<vmem>>, vector<8x128xf32>,
    %c0_5 = arith.constant 0 : index
    %c128 = arith.constant 128 : index
    %4 = vector.load %arg1[%c0_5, %c128] : memref<8x256xf32, #tpu.memory_space<vmem>>, vector<8x128xf32>
    %5 = arith.addf %4, %0 : vector<8x128xf32>
    %c0_6 = arith.constant 0 : index
    %c128_7 = arith.constant 128 : index
    %6 = vector.load %arg3[%c0_6, %c128_7] : memref<8x256xf32, #tpu.memory_space<vmem>>, vector<8x128xf32>
    tpu.vector_store %arg3[%c0_6, %c128_7], %5 {strides = array<i32>} : memref<8x256xf32, #tpu.memory_space<vmem>>, vector<8x128xf32>,
    return
  }
  func.func @transform_0(%arg0: i32) -> (i32, i32) {
    %c0_i32 = arith.constant 0 : i32
    %c0_i32_0 = arith.constant 0 : i32
    return %arg0, %c0_i32 : i32, i32
  }
  func.func @transform_1(%arg0: i32) -> (i32, i32) {
    %c0_i32 = arith.constant 0 : i32
    %c0_i32_0 = arith.constant 0 : i32
    return %arg0, %c0_i32 : i32, i32
  }
  func.func @transform_2(%arg0: i32) -> (i32, i32) {
    %c0_i32 = arith.constant 0 : i32
    %c0_i32_0 = arith.constant 0 : i32
    return %arg0, %c0_i32 : i32, i32
  }
}

</mosaic_0001>

<bundles_post_ra>
// kernel: tpu_custom_call.1
= control target key start
LH: loop header
LB: loop body
LE: loop exit
PB: predicated region body
PF: predicated region fallthrough
CT: control target
= control target key end

     0   :  { %7 = vsyncpa [#allocation3], 0  ;;  %s155_s0 = inlined_call_operand.hbm [shape: f32[8,256], index: 0, kind: input, shape index: {}]   ;;  %s156_s1 = inlined_call_operand.hbm [shape: f32[1024,128], index: 1, kind: input, shape index: {}]   ;;  %s157_s2 = inlined_call_operand.hbm [shape: f32[8,256], index: 2, kind: output, shape index: {}]  }
   0x1   :  { %8 = vsyncpa [#allocation6], 0 }
   0x2   :  { %9 = vsyncpa [#allocation4], 0  ;;  %s128_s9 = smov [#allocation2]   ;;  %s129_s11 = smov [#allocation5]  }
   0x3   :  { %s16_s10 = sshll.u32 %s128_s9, 4  ;;  %s26_s12 = sshll.u32 %s129_s11, 4  ;;  %s17_s10 = int_to_ptr.vmem [resolvable:$true] %s16_s10  ;;  %s27_s12 = int_to_ptr.vmem [resolvable:$true] %s26_s12 }
   0x4   :  { %s70_s13 = scalar_lea.vmem %s17_s10, 256  ;;  %p75_p1 = scmp.lt.s32.totalorder %s17_s10, %s17_s10 }
   0x5   :  { %p71_p0 = scmp.ne.s32.totalorder %s17_s10, %s70_s13  ;;  %p76_p2 = scmp.lt.s32.totalorder %s70_s13, %s70_s13 }
   0x7   :  { %p77_p3 = por %p76_p2, %p75_p1 }
   0x9   :  { %p78_p4 = pnand %p77_p3, %p71_p0 }
   0xb   :  { %81 = shalt.err (!%p78_p4)
}
   0xc   :  { %19 = dma.hbm_to_vmem [thread:$0]  %s155_s0, 256, %s17_s10, [#allocation3]  }
   0xd   :  { %s90_s16 = scalar_lea.vmem %s27_s12, 128  ;;  %p95_p6 = scmp.lt.s32.totalorder %s27_s12, %s27_s12 }
   0xe   :  { %p91_p5 = scmp.ne.s32.totalorder %s27_s12, %s90_s16  ;;  %p96_p7 = scmp.lt.s32.totalorder %s90_s16, %s90_s16 }
  0x10   :  { %p97_p8 = por %p96_p7, %p95_p6 }
  0x12   :  { %p98_p9 = pnand %p97_p8, %p91_p5 }
  0x14   :  { %101 = shalt.err (!%p98_p9)
}
  0x15   :  { %29 = dma.hbm_to_vmem [thread:$0]  %s156_s1, 128, %s27_s12, [#allocation6]  }
  0x16   :  { %122 = dma.done.wait [#allocation3], 256  }
  0x17   :  { %123 = vsyncadd [#allocation3], 4294967040 }
  0x18   :  { %124 = dma.done.wait [#allocation6], 128  }
  0x19   :  { %125 = vsyncadd [#allocation6], 4294967168  ;;  %s130_s19 = smov [#allocation7]   ;;  %v36_v0 = vld [vmem:[#allocation5] sm:$0xff]  ;;  %v37_v1 = vld [vmem:[#allocation2] sm:$0xff] }
  0x1a   :  { %s49_s20 = sshll.u32 %s130_s19, 4  ;;  %v40_v2 = vld [vmem:[#allocation2 + $0x8] sm:$0xff]  ;;  %v38_v3 = vadd.f32 %v37_v1, %v36_v0  ;;  %s50_s20 = int_to_ptr.vmem [resolvable:$true] %s49_s20 }
  0x1b   :  { %v41_v4 = vadd.f32 %v40_v2, %v36_v0  ;;  %s102_s0 = scalar_lea.vmem %s50_s20, 256  ;;  %p107_p11 = scmp.lt.s32.totalorder %s50_s20, %s50_s20 }
  0x1c   :  { %39 = vst [vmem:[#allocation7] sm:$0xff] %v38_v3  ;;  %p103_p10 = scmp.ne.s32.totalorder %s50_s20, %s102_s0  ;;  %p108_p12 = scmp.lt.s32.totalorder %s102_s0, %s102_s0 }
  0x1d   :  { %42 = vst [vmem:[#allocation7 + $0x8] sm:$0xff] %v41_v4 }
  0x1e   :  { %p109_p13 = por %p108_p12, %p107_p11 }
  0x20   :  { %p110_p0 = pnand %p109_p13, %p103_p10 }
  0x22   :  { %113 = shalt.err (!%p110_p0)
}
  0x23   :  { %52 = dma.vmem_to_hbm [thread:$0]  %s50_s20, 256, %s157_s2, [#allocation4]  }
  0x24   :  { %126 = dma.done.wait [#allocation4], 256  }
  0x25   :  { %127 = vsyncadd [#allocation4], 4294967040 }
  0x26   :  { %56 = vsyncpa [#allocation3], 1 }
  0x27   :  { %57 = vsyncpa [#allocation6], 1 }
  0x28   :  { %58 = vsyncpa [#allocation4], 1 }

</bundles_post_ra>
